<compile_context>
chip_gen: v5e
topology: v5e:2x2
jax: 0.10.0
libtpu: 0.0.40
codegen_flags: <defaults>
</compile_context>

<pallas_src>
import jax
import jax.numpy as jnp
from jax import lax
from jax.experimental import pallas as pl
from jax.experimental.pallas import tpu as pltpu

DIM_INPUT = 75 * 75          # 5625
DIM_OUTPUT = 1
MAX_TB = 512                 # batch tile cap (VMEM-safe on v5e/v6e/v7x)


def _round_up(x, m):
    return ((x + m - 1) // m) * m


def ridge_linear_kernel(w_ref, x_ref, b_ref, o_ref):
    """One batch tile: o (1, TB) = W (1, K) . x_tile (TB, K)^T + b."""
    acc = lax.dot_general(
        w_ref[...], x_ref[...],
        dimension_numbers=(((1,), (1,)), ((), ())),   # contract on K
        preferred_element_type=jnp.float32,
    )                                                 # -> (1, TB), lane-dense
    o_ref[...] = (acc + b_ref[0]).astype(o_ref.dtype)


@jax.jit
def ridge_classifier_forward(x, weight, bias):
    """Forward of RidgeClassifierMNIST.

    Args:
      x:      (B, 1, 75, 75) float32, NCHW (matches the PyTorch module).
      weight: (1, 5625) float32 (PyTorch nn.Linear layout: out x in).
      bias:   (1,) float32.

    Returns:
      (B, 1) float32.
    """
    B = x.shape[0]
    x_flat = x.reshape(B, -1)                      # (B, K); contiguous, free
    K = x_flat.shape[1]
    assert K == DIM_INPUT

    # Batch tile: whole batch if small, else 512-row tiles (pad batch only).
    TB = B if B <= MAX_TB else MAX_TB
    B_pad = _round_up(B, TB)
    if B_pad != B:
        x_flat = jnp.pad(x_flat, ((0, B_pad - B), (0, 0)))

    grid = (B_pad // TB,)

    cost = pl.CostEstimate(
        flops=2 * B_pad * K,
        transcendentals=0,
        bytes_accessed=B_pad * K * 4 + K * 4 + B_pad * 4,
    )

    out = pl.pallas_call(
        ridge_linear_kernel,
        out_shape=jax.ShapeDtypeStruct((1, B_pad), jnp.float32),
        grid_spec=pltpu.PrefetchScalarGridSpec(
            num_scalar_prefetch=0,
            grid=grid,
            in_specs=[
                # Weight: fully resident, constant block index -> single DMA.
                pl.BlockSpec((1, K), lambda i: (0, 0)),
                # x: one batch tile per grid step, full (unpadded) K as lanes.
                pl.BlockSpec((TB, K), lambda i: (i, 0)),
                # Bias: single scalar in SMEM.
                pl.BlockSpec(memory_space=pltpu.MemorySpace.SMEM),
            ],
            # Lane-dense output: batch on the lane axis.
            out_specs=pl.BlockSpec((1, TB), lambda i: (0, i)),
        ),
        compiler_params=pltpu.CompilerParams(
            dimension_semantics=("parallel",),   # independent batch tiles
        ),
        cost_estimate=cost,
    )(weight, x_flat, bias)

    # (1, B_pad) -> (B, 1) in the wrapper (tiny, layout plumbing only).
    return out[0, :B].reshape(B, DIM_OUTPUT)


def init_params(key):
    """Deterministic synthetic init of nn.Linear(5625, 1) parameters."""
    kw, kb = jax.random.split(key)
    bound = 1.0 / (DIM_INPUT ** 0.5)
    weight = jax.random.uniform(
        kw, (DIM_OUTPUT, DIM_INPUT), jnp.float32, minval=-bound, maxval=bound
    )
    bias = jax.random.uniform(
        kb, (DIM_OUTPUT,), jnp.float32, minval=-bound, maxval=bound
    )
    return weight, bias


if __name__ == "__main__":
    key = jax.random.PRNGKey(0)
    k_x, k_p = jax.random.split(key)

    B = 2
    # Input consistent with dim_input = 75*75: NCHW (B, 1, 75, 75).
    x = jax.random.normal(k_x, (B, 1, 75, 75), jnp.float32)
    weight, bias = init_params(k_p)

    y = ridge_classifier_forward(x, weight, bias)
    y = jax.block_until_ready(y)

    # Reference check in plain JAX (same semantics as the PyTorch forward).
    y_ref = x.reshape(B, -1) @ weight.T + bias
    assert y.shape == (B, 1)
    assert jnp.allclose(y, y_ref, atol=1e-4, rtol=1e-4), (y, y_ref)

    print("KERNEL_OK")
</pallas_src>

<mosaic_0001>
module attributes {stable_mosaic.version = 11 : i64} {
  func.func @ridge_linear_kernel(%arg0: i32, %arg1: memref<1x5625xf32, #tpu.memory_space<vmem>>, %arg2: memref<2x5625xf32, #tpu.memory_space<vmem>>, %arg3: memref<1xf32, #tpu.memory_space<smem>>, %arg4: memref<1x2xf32, #tpu.memory_space<vmem>>) attributes {dimension_semantics = [#tpu.dimension_semantics<parallel>], iteration_bounds = array<i64: 1>, scalar_prefetch = 0 : i64, scratch_operands = 0 : i64, tpu.core_type = #tpu.core_type<tc>, window_params = [{pipeline_mode = #tpu.pipeline_mode<synchronous>, transform_indices = @transform_0, window_bounds = array<i64: 1, 5625>}, {transform_indices = @transform_1, window_bounds = array<i64: 2, 5625>}, {transform_indices = @transform_2, window_bounds = array<i64: 1>}, {transform_indices = @transform_3, window_bounds = array<i64: 1, 2>}]} {
    %c0 = arith.constant 0 : index
    %c0_0 = arith.constant 0 : index
    %0 = vector.load %arg1[%c0, %c0_0] : memref<1x5625xf32, #tpu.memory_space<vmem>>, vector<1x5625xf32>
    %c0_1 = arith.constant 0 : index
    %c0_2 = arith.constant 0 : index
    %1 = vector.load %arg2[%c0_1, %c0_2] : memref<2x5625xf32, #tpu.memory_space<vmem>>, vector<2x5625xf32>
    %cst = arith.constant dense<0.000000e+00> : vector<1x2xf32>
    %2 = tpu.matmul %0, %1, %cst {dimension_numbers = #tpu.dot_dimension_numbers<[1], [1], [0], [0], [0, 0, 1, 0], [], []>} : vector<1x5625xf32>, vector<2x5625xf32>, vector<1x2xf32> -> vector<1x2xf32>
    %c0_3 = arith.constant 0 : index
    %3 = memref.load %arg3[%c0_3] : memref<1xf32, #tpu.memory_space<smem>>
    %4 = vector.broadcast %3 : f32 to vector<1x2xf32>
    %5 = arith.addf %2, %4 : vector<1x2xf32>
    %c0_4 = arith.constant 0 : index
    %c0_5 = arith.constant 0 : index
    %6 = vector.load %arg4[%c0_4, %c0_5] : memref<1x2xf32, #tpu.memory_space<vmem>>, vector<1x2xf32>
    tpu.vector_store %arg4[%c0_4, %c0_5], %5 {strides = array<i32>} : memref<1x2xf32, #tpu.memory_space<vmem>>, vector<1x2xf32>,
    return
  }
  func.func @transform_0(%arg0: i32) -> (i32, i32) {
    %c0_i32 = arith.constant 0 : i32
    %c0_i32_0 = arith.constant 0 : i32
    %c0_i32_1 = arith.constant 0 : i32
    return %c0_i32, %c0_i32_0 : i32, i32
  }
  func.func @transform_1(%arg0: i32) -> (i32, i32) {
    %c0_i32 = arith.constant 0 : i32
    %c0_i32_0 = arith.constant 0 : i32
    return %arg0, %c0_i32 : i32, i32
  }
  func.func @transform_2(%arg0: i32) -> i32 {
    %c0_i32 = arith.constant 0 : i32
    %c0_i32_0 = arith.constant 0 : i32
    return %c0_i32 : i32
  }
  func.func @transform_3(%arg0: i32) -> (i32, i32) {
    %c0_i32 = arith.constant 0 : i32
    %c0_i32_0 = arith.constant 0 : i32
    return %c0_i32, %arg0 : i32, i32
  }
}

</mosaic_0001>

<bundles_post_ra>
// kernel: ridge_classifier_forward.1
= control target key start
LH: loop header
LB: loop body
LE: loop exit
PB: predicated region body
PF: predicated region fallthrough
CT: control target
= control target key end

     0   :  { %s1250_s0 = inlined_call_operand.vmem [shape: f32[1,5625], index: 0, kind: input, shape index: {}]   ;;  %s1251_s1 = inlined_call_operand.vmem [shape: f32[2,5625], index: 1, kind: input, shape index: {}]   ;;  %s1252_s2 = inlined_call_operand.<no memory space> [shape: f32[1], index: 2, kind: input, shape index: {}]   ;;  %s1253_s3 = inlined_call_operand.hbm [shape: f32[1,2], index: 3, kind: output, shape index: {}]  }
   0x1   :  { %v22_v0 = vld [vmem:[%s1251_s1] sm:$0xff]  ;;  %v23_v1 = vld [vmem:[%s1251_s1 + $0x8] sm:$0xff] }
   0x2   :  { %139 = vst [vmem:[#allocation1] ss:$4 sm:$0xff] %v22_v0  ;;  %v16_v2 = vld [vmem:[%s1250_s0] sm:$0xff] }
   0x3   :  { %141 = vst [vmem:[#allocation1 + $0x20] ss:$4 sm:$0xff] %v23_v1 }
   0x4   :  { %9 = vsyncpa [#allocation4], 0  ;;  %v43_v3 = vperm.slane %v16_v2, 2  ;;  %v24_v4 = vld [vmem:[%s1251_s1 + $0x10] sm:$0xff]  ;;  %v41_v5 = vperm.slane %v16_v2, 0  ;;  %v44_v6 = vperm.slane %v16_v2, 3 }
   0x5   :  { %v42_v7 = vperm.slane %v16_v2, 1  ;;  %v25_v10 = vld [vmem:[%s1251_s1 + $0x18] sm:$0xff]  ;;  %v47_v17 = vperm.slane %v16_v2, 6  ;;  %v45_v18 = vperm.slane %v16_v2, 4  ;;  %v48_v19 = vperm.slane %v16_v2, 7  ;;  %v26_v21 = vld [vmem:[%s1251_s1 + $0x20] sm:$0xff] }
   0x6   :  { %v46_v20 = vperm.slane %v16_v2, 5  ;;  %v17_v26 = vld [vmem:[%s1250_s0 + $0x8] sm:$0xff]  ;;  %v28_v36 = vld [vmem:[%s1251_s1 + $0x30] sm:$0xff]  ;;  %v29_v41 = vld [vmem:[%s1251_s1 + $0x38] sm:$0xff]  ;;  %vm238_vm0 = vcmask 990208   ;;  %s1132_s22 = sshll.u32 %s1253_s3, 4  ;;  %s1133_s22 = int_to_ptr.hbm [resolvable:$true] %s1132_s22 }
   0x7   :  { %v27_v28 = vld [vmem:[%s1251_s1 + $0x28] sm:$0xff]  ;;  %v51_v32 = vperm.slane %v17_v26, 2  ;;  %v49_v33 = vperm.slane %v17_v26, 0  ;;  %v52_v34 = vperm.slane %v17_v26, 3  ;;  %v50_v35 = vperm.slane %v17_v26, 1  ;;  %v18_v50 = vld [vmem:[%s1250_s0 + $0x10] sm:$0xff] }
   0x8   :  { %v55_v46 = vperm.slane %v17_v26, 6  ;;  %v53_v47 = vperm.slane %v17_v26, 4  ;;  %v56_v48 = vperm.slane %v17_v26, 7  ;;  %v54_v49 = vperm.slane %v17_v26, 5  ;;  %v30_v51 = vld [vmem:[%s1251_s1 + $0x40] sm:$0xff]  ;;  %v31_v63 = vld [vmem:[%s1251_s1 + $0x48] sm:$0xff] }
   0x9   :  { %v144_v8 = vld.sshfl [vmem:[#allocation1 + $0x10] sm:$0xff pattern:$0x73625140]  ;;  %v142_v9 = vld.sshfl [vmem:[#allocation1] sm:$0xff pattern:$0x73625140] }
   0xa   :  { %298 = vmatpush.xpose.msra.mxu2 %v144_v8  ;;  %258 = vmatpush.xpose.msra.mxu0 %v142_v9  ;;  %v145_v11 = vld.sshfl [vmem:[#allocation1 + $0x18] sm:$0xff pattern:$0x73625140]  ;;  %v148_v12 = vld.sshfl [vmem:[#allocation1 + $0x30] sm:$0xff pattern:$0x73625140] }
   0xb   :  { %318 = vmatpush.xpose.msra.mxu3 %v145_v11  ;;  %v143_v13 = vld.sshfl [vmem:[#allocation1 + $0x8] sm:$0xff pattern:$0x73625140]  ;;  %v146_v14 = vld.sshfl [vmem:[#allocation1 + $0x20] sm:$0xff pattern:$0x73625140] }
   0xc   :  { %150 = vst [vmem:[#allocation1] ss:$4 sm:$0xff] %v24_v4  ;;  %278 = vmatpush.xpose.msra.mxu1 %v143_v13  ;;  %v149_v15 = vld.sshfl [vmem:[#allocation1 + $0x38] sm:$0xff pattern:$0x73625140]  ;;  %v59_v56 = vperm.slane %v18_v50, 2 }
   0xd   :  { %299 = vmatmul.f32.vlgmr.msra.gmra.mxu2 %v43_v3  ;;  %259 = vmatmul.f32.vlgmr.msra.gmra.mxu0 %v41_v5  ;;  %v147_v16 = vld.sshfl [vmem:[#allocation1 + $0x28] sm:$0xff pattern:$0x73625140]  ;;  %v57_v57 = vperm.slane %v18_v50, 0  ;;  %v60_v61 = vperm.slane %v18_v50, 3  ;;  %v58_v0 = vperm.slane %v18_v50, 1 }
   0xe   :  { %378 = vmatpush.xpose.msrb.mxu2 %v148_v12  ;;  %338 = vmatpush.xpose.msrb.mxu0 %v146_v14  ;;  %151 = vst [vmem:[#allocation1 + $0x20] ss:$4 sm:$0xff] %v25_v10  ;;  %v63_v1 = vperm.slane %v18_v50, 6  ;;  %v61_v2 = vperm.slane %v18_v50, 4  ;;  %v64_v3 = vperm.slane %v18_v50, 7  ;;  %v62_v4 = vperm.slane %v18_v50, 5 }
   0xf   :  { %319 = vmatmul.f32.vlgmr.msra.gmra.mxu3 %v44_v6  ;;  %279 = vmatmul.f32.vlgmr.msra.gmra.mxu1 %v42_v7  ;;  %v32_v5 = vld [vmem:[%s1251_s1 + $0x50] sm:$0xff]  ;;  %v19_v10 = vld [vmem:[%s1250_s0 + $0x18] sm:$0xff]  ;;  %vm1123_vm1 = vcmask 8192  }
  0x10   :  { %358 = vmatpush.xpose.msrb.mxu1 %v147_v16  ;;  %398 = vmatpush.xpose.msrb.mxu3 %v149_v15  ;;  %v67_v11 = vperm.slane %v19_v10, 2  ;;  %v65_v12 = vperm.slane %v19_v10, 0  ;;  %v68_v13 = vperm.slane %v19_v10, 3  ;;  %v66_v14 = vperm.slane %v19_v10, 1 }
  0x11   :  { %v71_v15 = vperm.slane %v19_v10, 6  ;;  %v69_v16 = vperm.slane %v19_v10, 4 }
  0x13   :  { %v154_v22 = vld.sshfl [vmem:[#allocation1 + $0x10] sm:$0xff pattern:$0x73625140]  ;;  %v152_v23 = vld.sshfl [vmem:[#allocation1] sm:$0xff pattern:$0x73625140] }
  0x14   :  { %458 = vmatpush.xpose.msra.mxu2 %v154_v22  ;;  %418 = vmatpush.xpose.msra.mxu0 %v152_v23  ;;  %v155_v24 = vld.sshfl [vmem:[#allocation1 + $0x18] sm:$0xff pattern:$0x73625140]  ;;  %v153_v25 = vld.sshfl [vmem:[#allocation1 + $0x8] sm:$0xff pattern:$0x73625140] }
  0x15   :  { %379 = vmatmul.f32.vlgmr.msrb.gmra.mxu2 %v47_v17  ;;  %339 = vmatmul.f32.vlgmr.msrb.gmra.mxu0 %v45_v18  ;;  %160 = vst [vmem:[#allocation1] ss:$4 sm:$0xff] %v26_v21  ;;  %v158_v27 = vld.sshfl [vmem:[#allocation1 + $0x30] sm:$0xff pattern:$0x73625140]  ;;  %v72_v17 = vperm.slane %v19_v10, 7 }
  0x16   :  { %438 = vmatpush.xpose.msra.mxu1 %v153_v25  ;;  %v156_v29 = vld.sshfl [vmem:[#allocation1 + $0x20] sm:$0xff pattern:$0x73625140]  ;;  %v159_v30 = vld.sshfl [vmem:[#allocation1 + $0x38] sm:$0xff pattern:$0x73625140]  ;;  %478 = vmatpush.xpose.msra.mxu3 %v155_v24 }
  0x17   :  { %399 = vmatmul.f32.vlgmr.msrb.gmra.mxu3 %v48_v19  ;;  %359 = vmatmul.f32.vlgmr.msrb.gmra.mxu1 %v46_v20  ;;  %v157_v31 = vld.sshfl [vmem:[#allocation1 + $0x28] sm:$0xff pattern:$0x73625140]  ;;  %v70_v18 = vperm.slane %v19_v10, 5  ;;  %v20_v23 = vld [vmem:[%s1250_s0 + $0x20] sm:$0xff] }
  0x18   :  { %538 = vmatpush.xpose.msrb.mxu2 %v158_v27  ;;  %498 = vmatpush.xpose.msrb.mxu0 %v156_v29  ;;  %161 = vst [vmem:[#allocation1 + $0x20] ss:$4 sm:$0xff] %v27_v28  ;;  %v75_v24 = vperm.slane %v20_v23, 2  ;;  %v73_v25 = vperm.slane %v20_v23, 0  ;;  %v76_v26 = vperm.slane %v20_v23, 3  ;;  %v74_v27 = vperm.slane %v20_v23, 1 }
  0x1a   :  { %558 = vmatpush.xpose.msrb.mxu3 %v159_v30  ;;  %518 = vmatpush.xpose.msrb.mxu1 %v157_v31 }
  0x1c   :  { %v164_v37 = vld.sshfl [vmem:[#allocation1 + $0x10] sm:$0xff pattern:$0x73625140]  ;;  %v162_v38 = vld.sshfl [vmem:[#allocation1] sm:$0xff pattern:$0x73625140] }
  0x1d   :  { %459 = vmatmul.f32.vlgmr.msra.gmra.mxu2 %v51_v32  ;;  %419 = vmatmul.f32.vlgmr.msra.gmra.mxu0 %v49_v33  ;;  %v165_v39 = vld.sshfl [vmem:[#allocation1 + $0x18] sm:$0xff pattern:$0x73625140]  ;;  %v163_v40 = vld.sshfl [vmem:[#allocation1 + $0x8] sm:$0xff pattern:$0x73625140] }
  0x1e   :  { %618 = vmatpush.xpose.msra.mxu2 %v164_v37  ;;  %170 = vst [vmem:[#allocation1] ss:$4 sm:$0xff] %v28_v36  ;;  %578 = vmatpush.xpose.msra.mxu0 %v162_v38  ;;  %v79_v32 = vperm.slane %v20_v23, 6  ;;  %v77_v33 = vperm.slane %v20_v23, 4  ;;  %v21_v36 = vld [vmem:[%s1250_s0 + $0x28] sm:$0xf] }
  0x1f   :  { %479 = vmatmul.f32.vlgmr.msra.gmra.mxu3 %v52_v34  ;;  %439 = vmatmul.f32.vlgmr.msra.gmra.mxu1 %v50_v35  ;;  %v168_v42 = vld.sshfl [vmem:[#allocation1 + $0x30] sm:$0xff pattern:$0x73625140]  ;;  %v166_v43 = vld.sshfl [vmem:[#allocation1 + $0x20] sm:$0xff pattern:$0x73625140] }
  0x20   :  { %638 = vmatpush.xpose.msra.mxu3 %v165_v39  ;;  %598 = vmatpush.xpose.msra.mxu1 %v163_v40  ;;  %v169_v44 = vld.sshfl [vmem:[#allocation1 + $0x38] sm:$0xff pattern:$0x73625140]  ;;  %v167_v45 = vld.sshfl [vmem:[#allocation1 + $0x28] sm:$0xff pattern:$0x73625140] }
  0x21   :  { %171 = vst [vmem:[#allocation1 + $0x20] ss:$4 sm:$0xff] %v29_v41  ;;  %v80_v34 = vperm.slane %v20_v23, 7  ;;  %v78_v35 = vperm.slane %v20_v23, 5  ;;  %v83_v37 = vperm.slane %v21_v36, 2  ;;  %v81_v38 = vperm.slane %v21_v36, 0 }
  0x22   :  { %v84_v39 = vperm.slane %v21_v36, 3  ;;  %v82_v40 = vperm.slane %v21_v36, 1  ;;  %v34_v41 = vstv %s1252_s2  ;;  %s1170_s0 = smov [#allocation3]  }
  0x23   :  { %s1130_s2 = sshll.u32 %s1170_s0, 4  ;;  %s1131_s2 = int_to_ptr.vmem [resolvable:$true] %s1130_s2 }
  0x25   :  { %539 = vmatmul.f32.vlgmr.msrb.gmra.mxu2 %v55_v46  ;;  %499 = vmatmul.f32.vlgmr.msrb.gmra.mxu0 %v53_v47  ;;  %v174_v52 = vld.sshfl [vmem:[#allocation1 + $0x10] sm:$0xff pattern:$0x73625140]  ;;  %v172_v53 = vld.sshfl [vmem:[#allocation1] sm:$0xff pattern:$0x73625140] }
  0x26   :  { %698 = vmatpush.xpose.msrb.mxu2 %v168_v42  ;;  %v175_v54 = vld.sshfl [vmem:[#allocation1 + $0x18] sm:$0xff pattern:$0x73625140]  ;;  %v173_v55 = vld.sshfl [vmem:[#allocation1 + $0x8] sm:$0xff pattern:$0x73625140]  ;;  %658 = vmatpush.xpose.msrb.mxu0 %v166_v43 }
  0x27   :  { %559 = vmatmul.f32.vlgmr.msrb.gmra.mxu3 %v56_v48  ;;  %519 = vmatmul.f32.vlgmr.msrb.gmra.mxu1 %v54_v49  ;;  %180 = vst [vmem:[#allocation1] ss:$4 sm:$0xff] %v30_v51 }
  0x28   :  { %718 = vmatpush.xpose.msrb.mxu3 %v169_v44  ;;  %678 = vmatpush.xpose.msrb.mxu1 %v167_v45  ;;  %v178_v58 = vld.sshfl [vmem:[#allocation1 + $0x30] sm:$0xff pattern:$0x73625140]  ;;  %v176_v59 = vld.sshfl [vmem:[#allocation1 + $0x20] sm:$0xff pattern:$0x73625140] }
  0x29   :  { %v179_v60 = vld.sshfl [vmem:[#allocation1 + $0x38] sm:$0xff pattern:$0x73625140]  ;;  %v177_v62 = vld.sshfl [vmem:[#allocation1 + $0x28] sm:$0xff pattern:$0x73625140] }
  0x2a   :  { %181 = vst [vmem:[#allocation1 + $0x20] ss:$4 sm:$0xff] %v31_v63 }
  0x2d   :  { %619 = vmatmul.f32.vlgmr.msra.gmra.mxu2 %v59_v56  ;;  %579 = vmatmul.f32.vlgmr.msra.gmra.mxu0 %v57_v57 }
  0x2e   :  { %778 = vmatpush.xpose.msra.mxu2 %v174_v52  ;;  %738 = vmatpush.xpose.msra.mxu0 %v172_v53  ;;  %v184_v6 = vld.sshfl [vmem:[#allocation1 + $0x10] sm:$0xff pattern:$0x73625140]  ;;  %v182_v7 = vld.sshfl [vmem:[#allocation1] sm:$0xff pattern:$0x73625140] }
  0x2f   :  { %639 = vmatmul.f32.vlgmr.msra.gmra.mxu3 %v60_v61  ;;  %599 = vmatmul.f32.vlgmr.msra.gmra.mxu1 %v58_v0  ;;  %v185_v8 = vld.sshfl [vmem:[#allocation1 + $0x18] sm:$0xff pattern:$0x73625140]  ;;  %v183_v9 = vld.sshfl [vmem:[#allocation1 + $0x8] sm:$0xff pattern:$0x73625140] }
  0x30   :  { %798 = vmatpush.xpose.msra.mxu3 %v175_v54  ;;  %758 = vmatpush.xpose.msra.mxu1 %v173_v55  ;;  %190 = vst [vmem:[#allocation1] ss:$4 sm:$0xff] %v32_v5 }
  0x31   :  { %v188_v19 = vld.sshfl [vmem:[#allocation1 + $0x30] sm:$0xff pattern:$0x73625140]  ;;  %v186_v20 = vld.sshfl [vmem:[#allocation1 + $0x20] sm:$0xff pattern:$0x73625140] }
  0x32   :  { %v189_v21 = vld.sshfl [vmem:[#allocation1 + $0x38] sm:$0xff pattern:$0x73625140]  ;;  %v187_v22 = vld.sshfl [vmem:[#allocation1 + $0x28] sm:$0xff pattern:$0x73625140] }
  0x35   :  { %699 = vmatmul.f32.vlgmr.msrb.gmra.mxu2 %v63_v1  ;;  %659 = vmatmul.f32.vlgmr.msrb.gmra.mxu0 %v61_v2 }
  0x36   :  { %858 = vmatpush.xpose.msrb.mxu2 %v178_v58  ;;  %818 = vmatpush.xpose.msrb.mxu0 %v176_v59 }
  0x37   :  { %719 = vmatmul.f32.vlgmr.msrb.gmra.mxu3 %v64_v3  ;;  %679 = vmatmul.f32.vlgmr.msrb.gmra.mxu1 %v62_v4  ;;  %v193_v28 = vld.sshfl [vmem:[#allocation1 + $0x10] sm:$0xff pattern:$0x73625140]  ;;  %v191_v29 = vld.sshfl [vmem:[#allocation1] sm:$0xff pattern:$0x73625140] }
  0x38   :  { %878 = vmatpush.xpose.msrb.mxu3 %v179_v60  ;;  %838 = vmatpush.xpose.msrb.mxu1 %v177_v62  ;;  %v194_v30 = vld.sshfl [vmem:[#allocation1 + $0x18] sm:$0xff pattern:$0x73625140]  ;;  %v192_v31 = vld.sshfl [vmem:[#allocation1 + $0x8] sm:$0xff pattern:$0x73625140] }
  0x3d   :  { %779 = vmatmul.f32.vlgmr.msra.gmra.mxu2 %v67_v11  ;;  %739 = vmatmul.f32.vlgmr.msra.gmra.mxu0 %v65_v12 }
  0x3e   :  { %938 = vmatpush.xpose.msra.mxu2 %v184_v6  ;;  %898 = vmatpush.xpose.msra.mxu0 %v182_v7 }
  0x3f   :  { %799 = vmatmul.f32.vlgmr.msra.gmra.mxu3 %v68_v13  ;;  %759 = vmatmul.f32.vlgmr.msra.gmra.mxu1 %v66_v14 }
  0x40   :  { %958 = vmatpush.xpose.msra.mxu3 %v185_v8  ;;  %918 = vmatpush.xpose.msra.mxu1 %v183_v9 }
  0x45   :  { %859 = vmatmul.f32.vlgmr.msrb.gmra.mxu2 %v71_v15  ;;  %819 = vmatmul.f32.vlgmr.msrb.gmra.mxu0 %v69_v16 }
  0x46   :  { %1018 = vmatpush.xpose.msrb.mxu2 %v188_v19  ;;  %978 = vmatpush.xpose.msrb.mxu0 %v186_v20 }
  0x47   :  { %879 = vmatmul.f32.vlgmr.msrb.gmra.mxu3 %v72_v17  ;;  %839 = vmatmul.f32.vlgmr.msrb.gmra.mxu1 %v70_v18 }
  0x48   :  { %1038 = vmatpush.xpose.msrb.mxu3 %v189_v21  ;;  %998 = vmatpush.xpose.msrb.mxu1 %v187_v22 }
  0x4d   :  { %939 = vmatmul.f32.vlgmr.msra.gmra.mxu2 %v75_v24  ;;  %899 = vmatmul.f32.vlgmr.msra.gmra.mxu0 %v73_v25 }
  0x4e   :  { %1098 = vmatpush.xpose.msra.mxu2 %v193_v28  ;;  %1058 = vmatpush.xpose.msra.mxu0 %v191_v29 }
  0x4f   :  { %959 = vmatmul.f32.vlgmr.msra.gmra.mxu3 %v76_v26  ;;  %919 = vmatmul.f32.vlgmr.msra.gmra.mxu1 %v74_v27 }
  0x50   :  { %1141 = vmatpush.xpose.msk.msra.mxu3 %vm238_vm0, %v194_v30  ;;  %1078 = vmatpush.xpose.msra.mxu1 %v192_v31 }
  0x55   :  { %1019 = vmatmul.f32.vlgmr.msrb.gmra.mxu2 %v79_v32  ;;  %979 = vmatmul.f32.vlgmr.msrb.gmra.mxu0 %v77_v33 }
  0x57   :  { %1039 = vmatmul.f32.vlgmr.msrb.gmra.mxu3 %v80_v34  ;;  %999 = vmatmul.f32.vlgmr.msrb.gmra.mxu1 %v78_v35 }
  0x5d   :  { %1099 = vmatmul.f32.vlgmr.msra.gmra.mxu2 %v83_v37  ;;  %1059 = vmatmul.f32.vlgmr.msra.gmra.mxu0 %v81_v38 }
  0x5f   :  { %1142 = vmatmul.msk.f32.vlgmr.msra.gmra.mxu3 %vm238_vm0, %v84_v39  ;;  %1079 = vmatmul.f32.vlgmr.msra.gmra.mxu1 %v82_v40 }
  0x8a   :  { %v260_v42 = vpop.f32.mrf.mxu0 }
  0x8b   :  { %v261_v43 = vadd.f32 %v260_v42, %v34_v41 }
  0x8c   :  { %v280_v44 = vpop.f32.mrf.mxu1 }
  0x8d   :  { %v281_v45 = vadd.f32 %v280_v44, %v261_v43 }
  0x90   :  { %v300_v46 = vpop.f32.mrf.mxu2 }
  0x91   :  { %v301_v47 = vadd.f32 %v300_v46, %v281_v45 }
  0x92   :  { %v320_v48 = vpop.f32.mrf.mxu3  ;;  %v340_v49 = vpop.f32.mrf.mxu0 }
  0x93   :  { %v321_v50 = vadd.f32 %v320_v48, %v301_v47 }
  0x94   :  { %v360_v51 = vpop.f32.mrf.mxu1 }
  0x95   :  { %v341_v52 = vadd.f32 %v340_v49, %v321_v50 }
  0x97   :  { %v361_v53 = vadd.f32 %v360_v51, %v341_v52 }
  0x98   :  { %v380_v54 = vpop.f32.mrf.mxu2 }
  0x99   :  { %v381_v55 = vadd.f32 %v380_v54, %v361_v53 }
  0x9a   :  { %v400_v56 = vpop.f32.mrf.mxu3  ;;  %v420_v57 = vpop.f32.mrf.mxu0 }
  0x9b   :  { %v401_v58 = vadd.f32 %v400_v56, %v381_v55 }
  0x9c   :  { %v440_v59 = vpop.f32.mrf.mxu1 }
  0x9d   :  { %v421_v60 = vadd.f32 %v420_v57, %v401_v58 }
  0x9f   :  { %v441_v61 = vadd.f32 %v440_v59, %v421_v60 }
  0xa0   :  { %v460_v62 = vpop.f32.mrf.mxu2 }
  0xa1   :  { %v461_v63 = vadd.f32 %v460_v62, %v441_v61 }
  0xa2   :  { %v480_v0 = vpop.f32.mrf.mxu3  ;;  %v500_v1 = vpop.f32.mrf.mxu0 }
  0xa3   :  { %v481_v2 = vadd.f32 %v480_v0, %v461_v63 }
  0xa4   :  { %v520_v3 = vpop.f32.mrf.mxu1 }
  0xa5   :  { %v501_v4 = vadd.f32 %v500_v1, %v481_v2 }
  0xa7   :  { %v521_v5 = vadd.f32 %v520_v3, %v501_v4 }
  0xa8   :  { %v540_v6 = vpop.f32.mrf.mxu2 }
  0xa9   :  { %v541_v7 = vadd.f32 %v540_v6, %v521_v5 }
  0xaa   :  { %v560_v8 = vpop.f32.mrf.mxu3  ;;  %v580_v9 = vpop.f32.mrf.mxu0 }
  0xab   :  { %v561_v10 = vadd.f32 %v560_v8, %v541_v7 }
  0xac   :  { %v600_v11 = vpop.f32.mrf.mxu1 }
  0xad   :  { %v581_v12 = vadd.f32 %v580_v9, %v561_v10 }
  0xaf   :  { %v601_v13 = vadd.f32 %v600_v11, %v581_v12 }
  0xb0   :  { %v620_v14 = vpop.f32.mrf.mxu2 }
  0xb1   :  { %v621_v15 = vadd.f32 %v620_v14, %v601_v13 }
  0xb2   :  { %v640_v16 = vpop.f32.mrf.mxu3  ;;  %v660_v17 = vpop.f32.mrf.mxu0 }
  0xb3   :  { %v641_v18 = vadd.f32 %v640_v16, %v621_v15 }
  0xb4   :  { %v680_v19 = vpop.f32.mrf.mxu1 }
  0xb5   :  { %v661_v20 = vadd.f32 %v660_v17, %v641_v18 }
  0xb7   :  { %v681_v21 = vadd.f32 %v680_v19, %v661_v20 }
  0xb8   :  { %v700_v22 = vpop.f32.mrf.mxu2 }
  0xb9   :  { %v701_v23 = vadd.f32 %v700_v22, %v681_v21 }
  0xba   :  { %v720_v24 = vpop.f32.mrf.mxu3  ;;  %v740_v25 = vpop.f32.mrf.mxu0 }
  0xbb   :  { %v721_v26 = vadd.f32 %v720_v24, %v701_v23 }
  0xbc   :  { %v760_v27 = vpop.f32.mrf.mxu1 }
  0xbd   :  { %v741_v28 = vadd.f32 %v740_v25, %v721_v26 }
  0xbf   :  { %v761_v29 = vadd.f32 %v760_v27, %v741_v28 }
  0xc0   :  { %v780_v30 = vpop.f32.mrf.mxu2 }
  0xc1   :  { %v781_v31 = vadd.f32 %v780_v30, %v761_v29 }
  0xc2   :  { %v800_v32 = vpop.f32.mrf.mxu3  ;;  %v820_v33 = vpop.f32.mrf.mxu0 }
  0xc3   :  { %v801_v34 = vadd.f32 %v800_v32, %v781_v31 }
  0xc4   :  { %v840_v35 = vpop.f32.mrf.mxu1 }
  0xc5   :  { %v821_v36 = vadd.f32 %v820_v33, %v801_v34 }
  0xc7   :  { %v841_v37 = vadd.f32 %v840_v35, %v821_v36 }
  0xc8   :  { %v860_v38 = vpop.f32.mrf.mxu2 }
  0xc9   :  { %v861_v39 = vadd.f32 %v860_v38, %v841_v37 }
  0xca   :  { %v880_v40 = vpop.f32.mrf.mxu3  ;;  %v900_v41 = vpop.f32.mrf.mxu0 }
  0xcb   :  { %v881_v42 = vadd.f32 %v880_v40, %v861_v39 }
  0xcc   :  { %v920_v43 = vpop.f32.mrf.mxu1 }
  0xcd   :  { %v901_v44 = vadd.f32 %v900_v41, %v881_v42 }
  0xcf   :  { %v921_v45 = vadd.f32 %v920_v43, %v901_v44 }
  0xd0   :  { %v940_v46 = vpop.f32.mrf.mxu2 }
  0xd1   :  { %v941_v47 = vadd.f32 %v940_v46, %v921_v45 }
  0xd2   :  { %v960_v48 = vpop.f32.mrf.mxu3  ;;  %v980_v49 = vpop.f32.mrf.mxu0 }
  0xd3   :  { %v961_v50 = vadd.f32 %v960_v48, %v941_v47 }
  0xd4   :  { %v1000_v51 = vpop.f32.mrf.mxu1 }
  0xd5   :  { %v981_v52 = vadd.f32 %v980_v49, %v961_v50 }
  0xd7   :  { %v1001_v53 = vadd.f32 %v1000_v51, %v981_v52 }
  0xd8   :  { %v1020_v54 = vpop.f32.mrf.mxu2 }
  0xd9   :  { %v1021_v55 = vadd.f32 %v1020_v54, %v1001_v53 }
  0xda   :  { %v1040_v56 = vpop.f32.mrf.mxu3  ;;  %v1060_v57 = vpop.f32.mrf.mxu0 }
  0xdb   :  { %v1041_v58 = vadd.f32 %v1040_v56, %v1021_v55 }
  0xdc   :  { %v1080_v59 = vpop.f32.mrf.mxu1 }
  0xdd   :  { %v1061_v60 = vadd.f32 %v1060_v57, %v1041_v58 }
  0xdf   :  { %v1081_v61 = vadd.f32 %v1080_v59, %v1061_v60 }
  0xe0   :  { %v1100_v62 = vpop.f32.mrf.mxu2 }
  0xe1   :  { %v1101_v63 = vadd.f32 %v1100_v62, %v1081_v61 }
  0xe2   :  { %v1120_v0 = vpop.f32.mrf.mxu3 }
  0xe3   :  { %v1121_v1 = vadd.f32 %v1120_v0, %v1101_v63 }
  0xe5   :  { %1124 = vst.msk [vmem:[#allocation3] sm:$0x1] %vm1123_vm1, %v1121_v1 }
  0xe6   :  { %1135 = dma.vmem_to_hbm [thread:$0]  %s1131_s2, 16, %s1133_s22, [#allocation4]  }
  0xe7   :  { %1168 = dma.done.wait [#allocation4], 16  }
  0xe8   :  { %1169 = vsyncadd [#allocation4], 4294967280 }
  0xe9   :  { %1140 = vsyncpa [#allocation4], 1 }

</bundles_post_ra>
